<compile_context>
chip_gen: v7x
topology: tpu7x:2x2x1
jax: 0.10.0
libtpu: 0.0.40
codegen_flags: <defaults>
</compile_context>

<pallas_src>
import jax
import jax.numpy as jnp
from jax import lax
from jax.experimental import pallas as pl
from jax.experimental.pallas import tpu as pltpu  # noqa: F401  (TPU backend)

EPS = 1e-5
NEG_SLOPE = 0.01
LANES = 128


def basic_block_kernel(x_ref, w_ref, params_ref, o_ref):
    # x_ref:      (N, in_planes)     f32
    # w_ref:      (P_pad, in_planes) f32   (PyTorch nn.Linear layout, planes padded)
    # params_ref: (2, P_pad)         f32   row 0 = gamma, row 1 = beta
    # o_ref:      (N, P_pad)         f32   (lane-dense: P_pad % 128 == 0)
    n = x_ref.shape[0]

    # ---- Linear (MXU). bf16 operands feed the MXU at full rate on v6e/v7x;
    # accumulation stays f32. Bias omitted: it cancels under training-mode BN.
    x16 = x_ref[...].astype(jnp.bfloat16)
    w16 = w_ref[...].astype(jnp.bfloat16)
    y = lax.dot_general(
        x16, w16,
        dimension_numbers=(((1,), (1,)), ((), ())),  # contract K of x with K of W
        preferred_element_type=jnp.float32,
    )  # (N, P_pad) f32

    # ---- BatchNorm1d (training-mode batch stats), single pass over y.
    inv_n = 1.0 / n
    s = jnp.sum(y, axis=0, keepdims=True)              # (1, P_pad)
    ss = jnp.sum(y * y, axis=0, keepdims=True)         # (1, P_pad)
    mean = s * inv_n
    var = jnp.maximum(ss * inv_n - mean * mean, 0.0)   # biased variance
    gamma = params_ref[0:1, :]
    beta = params_ref[1:2, :]
    scale = lax.rsqrt(var + EPS) * gamma               # fold gamma (row op)
    shift = beta - mean * scale                        # fold mean   (row op)
    y_hat = y * scale + shift                          # 2 full-tile VPU ops

    # ---- LeakyReLU: one mul + one max.
    o_ref[...] = jnp.maximum(y_hat, NEG_SLOPE * y_hat).astype(o_ref.dtype)


def basic_block(x, weight, bias, gamma, beta):
    """Forward of BasicBlock.

    x: (N, in_planes); weight: (planes, in_planes); bias/gamma/beta: (planes,).
    `bias` is accepted for interface fidelity but mathematically cancels under
    training-mode BatchNorm, so it is not passed to the kernel.
    """
    del bias  # cancels exactly: diff = y - mean removes any per-feature constant
    n, in_planes = x.shape
    planes = weight.shape[0]

    # Pad the planes (lane) dim to a multiple of 128 -> unmasked, lane-dense
    # stores. Zero-padded weight rows give exactly-zero outputs, sliced away.
    p_pad = ((planes + LANES - 1) // LANES) * LANES
    if p_pad != planes:
        weight = jnp.pad(weight, ((0, p_pad - planes), (0, 0)))
        gamma = jnp.pad(gamma, (0, p_pad - planes), constant_values=1.0)
        beta = jnp.pad(beta, (0, p_pad - planes))
    params = jnp.stack([gamma, beta], axis=0)  # single (2, P_pad) operand

    full = lambda shape: pl.BlockSpec(shape, lambda: (0,) * len(shape))

    out = pl.pallas_call(
        basic_block_kernel,
        out_shape=jax.ShapeDtypeStruct((n, p_pad), jnp.float32),
        grid=(),
        in_specs=[
            full((n, in_planes)),
            full((p_pad, in_planes)),
            full((2, p_pad)),
        ],
        out_specs=full((n, p_pad)),
    )(x, weight, params)
    return out[:, :planes] if p_pad != planes else out


if __name__ == "__main__":
    # Small shapes consistent with the module: batch=8, in_planes=32, planes=64
    N, IN_PLANES, PLANES = 8, 32, 64

    key = jax.random.PRNGKey(0)
    kx, kw, kb, kg, kbe = jax.random.split(key, 5)

    x = jax.random.normal(kx, (N, IN_PLANES), dtype=jnp.float32)
    bound = 1.0 / (IN_PLANES ** 0.5)
    weight = jax.random.uniform(kw, (PLANES, IN_PLANES), jnp.float32, -bound, bound)
    bias = jax.random.uniform(kb, (PLANES,), jnp.float32, -bound, bound)
    gamma = 1.0 + 0.1 * jax.random.normal(kg, (PLANES,), dtype=jnp.float32)
    beta = 0.1 * jax.random.normal(kbe, (PLANES,), dtype=jnp.float32)

    out = basic_block(x, weight, bias, gamma, beta)
    jax.block_until_ready(out)
    assert out.shape == (N, PLANES)

    # --- Matched-numerics reference (bf16 matmul, f32 BN, with the bias to
    #     confirm it cancels): tight tolerance.
    y_m = lax.dot_general(
        x.astype(jnp.bfloat16), weight.astype(jnp.bfloat16),
        dimension_numbers=(((1,), (1,)), ((), ())),
        preferred_element_type=jnp.float32,
    ) + bias
    mean_m = y_m.mean(axis=0)
    var_m = ((y_m - mean_m) ** 2).mean(axis=0)
    yh_m = (y_m - mean_m) / jnp.sqrt(var_m + EPS) * gamma + beta
    ref_m = jnp.where(yh_m >= 0, yh_m, NEG_SLOPE * yh_m)
    assert jnp.allclose(out, ref_m, atol=1e-4, rtol=1e-4), "mismatch vs matched reference"

    # --- Full-f32 reference (exact PyTorch-style math): loose tolerance covers
    #     the bf16 MXU operand rounding.
    y_f = x @ weight.T + bias
    mean_f = y_f.mean(axis=0)
    var_f = ((y_f - mean_f) ** 2).mean(axis=0)
    yh_f = (y_f - mean_f) / jnp.sqrt(var_f + EPS) * gamma + beta
    ref_f = jnp.where(yh_f >= 0, yh_f, NEG_SLOPE * yh_f)
    assert jnp.allclose(out, ref_f, atol=5e-2, rtol=5e-2), "mismatch vs f32 reference"

    print("KERNEL_OK")
</pallas_src>

<mosaic_0001>
module attributes {stable_mosaic.version = 11 : i64} {
  func.func @basic_block_kernel(%arg0: memref<8x32xf32, #tpu.memory_space<vmem>>, %arg1: memref<128x32xf32, #tpu.memory_space<vmem>>, %arg2: memref<2x128xf32, #tpu.memory_space<vmem>>, %arg3: memref<8x128xf32, #tpu.memory_space<vmem>>) attributes {dimension_semantics = [], scalar_prefetch = 0 : i64, scratch_operands = 0 : i64, tpu.core_type = #tpu.core_type<tc>} {
    %c0 = arith.constant 0 : index
    %c0_0 = arith.constant 0 : index
    %0 = vector.load %arg0[%c0, %c0_0] : memref<8x32xf32, #tpu.memory_space<vmem>>, vector<8x32xf32>
    %1 = arith.truncf %0 : vector<8x32xf32> to vector<8x32xbf16>
    %c0_1 = arith.constant 0 : index
    %c0_2 = arith.constant 0 : index
    %2 = vector.load %arg1[%c0_1, %c0_2] : memref<128x32xf32, #tpu.memory_space<vmem>>, vector<128x32xf32>
    %3 = arith.truncf %2 : vector<128x32xf32> to vector<128x32xbf16>
    %cst = arith.constant dense<0.000000e+00> : vector<8x128xf32>
    %4 = tpu.matmul %1, %3, %cst {dimension_numbers = #tpu.dot_dimension_numbers<[1], [1], [0], [0], [0, 0, 1, 0], [], []>} : vector<8x32xbf16>, vector<128x32xbf16>, vector<8x128xf32> -> vector<8x128xf32>
    %cst_3 = arith.constant dense<0.000000e+00> : vector<128xf32>
    %5 = vector.multi_reduction <add>, %4, %cst_3 [0] : vector<8x128xf32> to vector<128xf32>
    %6 = vector.shape_cast %5 : vector<128xf32> to vector<1x128xf32>
    %7 = arith.mulf %4, %4 : vector<8x128xf32>
    %cst_4 = arith.constant dense<0.000000e+00> : vector<128xf32>
    %8 = vector.multi_reduction <add>, %7, %cst_4 [0] : vector<8x128xf32> to vector<128xf32>
    %9 = vector.shape_cast %8 : vector<128xf32> to vector<1x128xf32>
    %cst_5 = arith.constant 1.250000e-01 : f32
    %10 = vector.broadcast %cst_5 : f32 to vector<1x128xf32>
    %11 = arith.mulf %6, %10 : vector<1x128xf32>
    %cst_6 = arith.constant 1.250000e-01 : f32
    %12 = vector.broadcast %cst_6 : f32 to vector<1x128xf32>
    %13 = arith.mulf %9, %12 : vector<1x128xf32>
    %14 = arith.mulf %11, %11 : vector<1x128xf32>
    %15 = arith.subf %13, %14 : vector<1x128xf32>
    %cst_7 = arith.constant 0.000000e+00 : f32
    %16 = vector.broadcast %cst_7 : f32 to vector<1x128xf32>
    %17 = arith.maximumf %15, %16 : vector<1x128xf32>
    %c0_8 = arith.constant 0 : index
    %c0_9 = arith.constant 0 : index
    %18 = vector.load %arg2[%c0_8, %c0_9] : memref<2x128xf32, #tpu.memory_space<vmem>>, vector<1x128xf32>
    %c1 = arith.constant 1 : index
    %c0_10 = arith.constant 0 : index
    %19 = vector.load %arg2[%c1, %c0_10] : memref<2x128xf32, #tpu.memory_space<vmem>>, vector<1x128xf32>
    %cst_11 = arith.constant 9.99999974E-6 : f32
    %20 = vector.broadcast %cst_11 : f32 to vector<1x128xf32>
    %21 = arith.addf %17, %20 : vector<1x128xf32>
    %22 = math.rsqrt %21 : vector<1x128xf32>
    %23 = arith.mulf %22, %18 : vector<1x128xf32>
    %24 = arith.mulf %11, %23 : vector<1x128xf32>
    %25 = arith.subf %19, %24 : vector<1x128xf32>
    %26 = vector.broadcast %23 : vector<1x128xf32> to vector<8x128xf32>
    %27 = arith.mulf %4, %26 : vector<8x128xf32>
    %28 = vector.broadcast %25 : vector<1x128xf32> to vector<8x128xf32>
    %29 = arith.addf %27, %28 : vector<8x128xf32>
    %cst_12 = arith.constant 0.00999999977 : f32
    %30 = vector.broadcast %cst_12 : f32 to vector<8x128xf32>
    %31 = arith.mulf %30, %29 : vector<8x128xf32>
    %32 = arith.maximumf %29, %31 : vector<8x128xf32>
    %c0_13 = arith.constant 0 : index
    %c0_14 = arith.constant 0 : index
    %33 = vector.load %arg3[%c0_13, %c0_14] : memref<8x128xf32, #tpu.memory_space<vmem>>, vector<8x128xf32>
    tpu.vector_store %arg3[%c0_13, %c0_14], %32 {strides = array<i32>} : memref<8x128xf32, #tpu.memory_space<vmem>>, vector<8x128xf32>,
    return
  }
}

</mosaic_0001>

<bundles_post_ra>
// kernel: tpu_custom_call.1
= control target key start
LH: loop header
LB: loop body
LE: loop exit
PB: predicated region body
PF: predicated region fallthrough
CT: control target
= control target key end

     0   :  { %vm42_vm0 = vcmask 261120   ;;  %v221_v2 = vmov 0.0   ;;  %vm222_vm1 = vmmov 0   ;;  %s322_s0 = inlined_call_operand.vmem [shape: f32[8,32], index: 0, kind: input, shape index: {}]   ;;  %s323_s1 = inlined_call_operand.vmem [shape: f32[128,32], index: 1, kind: input, shape index: {}]   ;;  %s324_s2 = inlined_call_operand.vmem [shape: f32[2,128], index: 2, kind: input, shape index: {}]   ;;  %s325_s3 = inlined_call_operand.hbm [shape: f32[8,128], index: 3, kind: output, shape index: {}]  }
   0x1   :  { %v18_v0 = vld [vmem:[%s323_s1] sm:$0xff]  ;;  %v19_v1 = vld [vmem:[%s323_s1 + $0x8] sm:$0xff]  ;;  %172 = vmatprep.subr.bf16.mxu0 %v221_v2  ;;  %188 = vmatprep.mubr.msk.bf16.mxu0 %vm222_vm1, %v221_v2  ;;  %v20_v4 = vld [vmem:[%s323_s1 + $0x10] sm:$0xff] }
   0x2   :  { %v34_v3 = vpack.c.bf16 %v19_v1, %v18_v0  ;;  %v21_v5 = vld [vmem:[%s323_s1 + $0x18] sm:$0xff] }
   0x3   :  { %v35_v7 = vpack.c.bf16 %v21_v5, %v20_v4 }
   0x4   :  { %v47_v6 = vsel %vm42_vm0, %v34_v3, 0 }
   0x5   :  { %173 = vmatpush3.bf16.xpose.msra.mxu0 %v47_v6 }
   0x6   :  { %174 = vmatprep.subr.bf16.mxu0 %v221_v2 }
   0x7   :  { %8 = vsyncpa [#allocation3], 0  ;;  %v50_v8 = vsel %vm42_vm0, %v35_v7, 0  ;;  %v22_v9 = vld [vmem:[%s323_s1 + $0x20] sm:$0xff]  ;;  %v23_v10 = vld [vmem:[%s323_s1 + $0x28] sm:$0xff]  ;;  %v135_v58 = vlaneseq  ;;  %s223_s21 = smov [#allocation2]  }
   0x8   :  { %v36_v11 = vpack.c.bf16 %v23_v10, %v22_v9  ;;  %v24_v13 = vld [vmem:[%s323_s1 + $0x30] sm:$0xff]  ;;  %v25_v14 = vld [vmem:[%s323_s1 + $0x38] sm:$0xff]  ;;  %v26_v17 = vld [vmem:[%s323_s1 + $0x40] sm:$0xff]  ;;  %s154_s22 = sshll.u32 %s223_s21, 4  ;;  %s155_s22 = int_to_ptr.vmem [resolvable:$true] %s154_s22 }
   0x9   :  { %v37_v15 = vpack.c.bf16 %v25_v14, %v24_v13  ;;  %v27_v18 = vld [vmem:[%s323_s1 + $0x48] sm:$0xff]  ;;  %v28_v21 = vld [vmem:[%s323_s1 + $0x50] sm:$0xff]  ;;  %v29_v22 = vld [vmem:[%s323_s1 + $0x58] sm:$0xff]  ;;  %v136_v59 = vshrl.u32 %v135_v58, 7  ;;  %s197_s23 = scalar_lea.vmem %s155_s22, 128  ;;  %p202_p1 = scmp.lt.s32.totalorder %s155_s22, %s155_s22 }
   0xa   :  { %v53_v12 = vsel %vm42_vm0, %v36_v11, 0  ;;  %v38_v19 = vpack.c.bf16 %v27_v18, %v26_v17  ;;  %v39_v23 = vpack.c.bf16 %v29_v22, %v28_v21  ;;  %v30_v25 = vld [vmem:[%s323_s1 + $0x60] sm:$0xff]  ;;  %v31_v26 = vld [vmem:[%s323_s1 + $0x68] sm:$0xff]  ;;  %v32_v29 = vld [vmem:[%s323_s1 + $0x70] sm:$0xff]  ;;  %p198_p0 = scmp.ne.s32.totalorder %s155_s22, %s197_s23  ;;  %p203_p2 = scmp.lt.s32.totalorder %s197_s23, %s197_s23 }
   0xb   :  { %v56_v16 = vsel %vm42_vm0, %v37_v15, 0  ;;  %v40_v27 = vpack.c.bf16 %v31_v26, %v30_v25  ;;  %v33_v30 = vld [vmem:[%s323_s1 + $0x78] sm:$0xff]  ;;  %v16_v33 = vld [vmem:[%s322_s0] sm:$0xff]  ;;  %v137_v61 = vsub.s32 0, %v136_v59 }
   0xc   :  { %v59_v20 = vsel %vm42_vm0, %v38_v19, 0  ;;  %v62_v24 = vsel %vm42_vm0, %v39_v23, 0  ;;  %v41_v31 = vpack.c.bf16 %v33_v30, %v32_v29  ;;  %v17_v34 = vpack.c.bf16 %v16_v33, %v16_v33  ;;  %v128_v60 = vld [vmem:[%s324_s2] sm:$0x1]  ;;  %v129_v0 = vld [vmem:[%s324_s2 + $0x1] sm:$0x1]  ;;  %p204_p3 = por %p203_p2, %p202_p1 }
   0xd   :  { %175 = vmatpush3.bf16.xpose.msra.mxu0 %v50_v8  ;;  %v65_v28 = vsel %vm42_vm0, %v40_v27, 0 }
   0xe   :  { %176 = vmatprep.subr.bf16.mxu0 %v221_v2  ;;  %v68_v32 = vsel %vm42_vm0, %v41_v31, 0  ;;  %p205_p4 = pnand %p204_p3, %p198_p0 }
  0x15   :  { %177 = vmatpush3.bf16.xpose.msra.mxu0 %v53_v12 }
  0x16   :  { %178 = vmatprep.subr.bf16.mxu0 %v221_v2 }
  0x1d   :  { %179 = vmatpush3.bf16.xpose.msra.mxu0 %v56_v16 }
  0x1e   :  { %180 = vmatprep.subr.bf16.mxu0 %v221_v2 }
  0x25   :  { %181 = vmatpush3.bf16.xpose.msra.mxu0 %v59_v20 }
  0x26   :  { %182 = vmatprep.subr.bf16.mxu0 %v221_v2 }
  0x2d   :  { %183 = vmatpush3.bf16.xpose.msra.mxu0 %v62_v24 }
  0x2e   :  { %184 = vmatprep.subr.bf16.mxu0 %v221_v2 }
  0x35   :  { %185 = vmatpush3.bf16.xpose.msra.mxu0 %v65_v28 }
  0x36   :  { %186 = vmatprep.subr.bf16.mxu0 %v221_v2 }
  0x3d   :  { %187 = vmatpush3.bf16.xpose.msra.mxu0 %v68_v32 }
  0x44   :  { %189 = vmatmul.mubr.msk.bf16.vlgmr.msra.gmra.mrb[0].mxu0 %vm42_vm0, %v17_v34 }
 0x117   :  { %v104_v35 = vpop.f32.mrb[0].mxu0 }
 0x118   :  { %v110_v36 = vrot.slane %v104_v35, 4  ;;  %v116_v37 = vmul.f32 %v104_v35, %v104_v35  ;;  %v190_v38 = vpop.f32.mrb[1].mxu0 }
 0x119   :  { %v107_v39 = vpop.f32.mrb[2].mxu0 }
 0x11a   :  { %v111_v40 = vadd.f32 %v110_v36, %v104_v35  ;;  %v117_v41 = vrot.slane %v116_v37, 4  ;;  %v191_v42 = vpop.f32.mrb[3].mxu0 }
 0x11c   :  { %v112_v43 = vrot.slane %v111_v40, 2  ;;  %v118_v44 = vadd.f32 %v117_v41, %v116_v37 }
 0x11e   :  { %v113_v45 = vadd.f32 %v112_v43, %v111_v40  ;;  %v119_v46 = vrot.slane %v118_v44, 2 }
 0x120   :  { %v114_v47 = vrot.slane %v113_v45, 1  ;;  %v120_v48 = vadd.f32 %v119_v46, %v118_v44 }
 0x122   :  { %v115_v49 = vadd.f32 %v114_v47, %v113_v45  ;;  %v121_v50 = vrot.slane %v120_v48, 1 }
 0x124   :  { %v122_v51 = vadd.f32 %v121_v50, %v120_v48  ;;  %v123_v52 = vmul.f32 0.125, %v115_v49 }
 0x126   :  { %v124_v53 = vmul.f32 0.125, %v122_v51  ;;  %v125_v54 = vmul.f32 %v123_v52, %v123_v52 }
 0x128   :  { %v126_v55 = vsub.f32 %v124_v53, %v125_v54 }
 0x12a   :  { %v127_v56 = vmax.f32 %v126_v55, 0.0 }
 0x12c   :  { %v130_v57 = vadd.f32 1e-05, %v127_v56 }
 0x12e   :  { %195 = vrsqrt.f32 %v130_v57 }
 0x138   :  { %v196_v62 = vpop.eup %195 }
 0x139   :  { %v132_v63 = vmul.f32 %v196_v62, %v128_v60 }
 0x13b   :  { %v138_v1 = vrot.slane %v132_v63, %v137_v61  ;;  %v133_v2 = vmul.f32 %v132_v63, %v123_v52 }
 0x13d   :  { %v134_v3 = vsub.f32 %v129_v0, %v133_v2  ;;  %v139_v4 = vmul.f32 %v138_v1, %v104_v35 }
 0x13f   :  { %v143_v5 = vrot.slane %v134_v3, %v137_v61 }
 0x141   :  { %v144_v6 = vadd.f32 %v143_v5, %v139_v4 }
 0x143   :  { %v145_v7 = vmul.f32 0.01, %v144_v6 }
 0x145   :  { %v146_v8 = vmax.f32 %v144_v6, %v145_v7 }
 0x147   :  { %147 = vst [vmem:[#allocation2] sm:$0xff] %v146_v8 }
 0x148   :  { %208 = shalt.err (!%p205_p4)
}
 0x149   :  { %s209_s25 = scalar_lea.hbm %s325_s3, 128 }
 0x14a   :  { %p210_p5 = scmp.ne.s32.totalorder %s325_s3, %s209_s25  ;;  %p213_p6 = scmp.lt.u32.totalorder %s209_s25, %s325_s3 }
 0x14c   :  { %p215_p7 = pnand %p213_p6, %p210_p5 }
 0x14e   :  { %218 = shalt.err (!%p215_p7)
}
 0x14f   :  { %157 = dma.vmem_to_hbm [thread:$0]  %s155_s22, 128, %s325_s3, [#allocation3]  }
 0x150   :  { %219 = dma.done.wait [#allocation3], 128  }
 0x151   :  { %220 = vsyncadd [#allocation3], 4294967168 }
 0x152   :  { %161 = vsyncpa [#allocation3], 1 }

</bundles_post_ra>
